<compile_context>
chip_gen: v7x
topology: tpu7x:2x2x1
jax: 0.10.0
libtpu: 0.0.40
codegen_flags: <defaults>
</compile_context>

<pallas_src>
import functools

import jax
import jax.numpy as jnp
from jax import lax
from jax.experimental import pallas as pl
from jax.experimental.pallas import tpu as pltpu

LANE = 128                       # lane width (last dim of every block)
SUB = 8                          # f32 sublane granularity of the accumulator
NCORES = 2                       # leading "parallel" axis (sharded on v7x)
NCHUNK = 8                       # independent reduction chunks per block
TARGET_BLOCK_BYTES = 4 * 1024 * 1024   # per-input per-buffer block target (f32-equiv)


def _min_sublanes(dtype):
    itemsize = jnp.dtype(dtype).itemsize
    return {4: 8, 2: 16, 1: 32}.get(itemsize, 8)


def _accumulate(inp_ref, tgt_ref, out_ref, *, tm, ignore_index, row_limit):
    """Adds sum(((x - t) * mask)^2) of the current block into out_ref (8,128).

    row_limit is a STATIC Python int (valid rows of the ragged last block) or
    None for full interior blocks. The block is processed in up to NCHUNK
    independent row-chunks to bound live temporaries and break the serial
    vreg-add dependence chain.
    """
    nslabs = tm // SUB
    # Near-equal contiguous chunk split (all Python-static).
    chunks = []
    start = 0
    for a in range(NCHUNK):
        cnt = (nslabs - start) // (NCHUNK - a)
        if cnt > 0:
            chunks.append((start * SUB, cnt * SUB))
            start += cnt

    accs = []
    for r0, rcnt in chunks:
        lim = None if row_limit is None else min(row_limit - r0, rcnt)
        if lim is not None and lim <= 0:
            continue  # chunk lies entirely past the valid rows: contributes 0
        x_raw = inp_ref[pl.ds(r0, rcnt), :]
        t_raw = tgt_ref[pl.ds(r0, rcnt), :]
        # Compare in the target's native dtype (matches PyTorch's `target.ne_`).
        keep = t_raw != jnp.asarray(ignore_index, dtype=t_raw.dtype)
        if lim is not None and lim < rcnt:
            rowidx = lax.broadcasted_iota(jnp.int32, (rcnt, LANE), 0)
            keep = jnp.logical_and(keep, rowidx < lim)
        d = jnp.where(keep,
                      x_raw.astype(jnp.float32) - t_raw.astype(jnp.float32),
                      jnp.float32(0.0))
        d2 = d * d
        # Lane/sublane-parallel partial reduce: layout-preserving reshape
        # (splits the sublane axis in groups of 8), then sum over slabs.
        accs.append(jnp.sum(d2.reshape(rcnt // SUB, SUB, LANE), axis=0))

    # Small tree-add of the (<= NCHUNK) chunk partials.
    while len(accs) > 1:
        nxt = [accs[i] + accs[i + 1] for i in range(0, len(accs) - 1, 2)]
        if len(accs) % 2:
            nxt.append(accs[-1])
        accs = nxt
    out_ref[...] += accs[0]


def _masked_mse_kernel(inp_ref, tgt_ref, out_ref, *, ignore_index, tm,
                       steps_per_core, nb_full, ragged_rows):
    c = pl.program_id(0)
    s = pl.program_id(1)
    block_id = c * steps_per_core + s

    @pl.when(s == 0)
    def _():
        out_ref[...] = jnp.zeros_like(out_ref)

    # Full interior blocks: no row masking at all. This also skips clamped
    # duplicate blocks (block_id >= number of real blocks).
    @pl.when(block_id < nb_full)
    def _():
        _accumulate(inp_ref, tgt_ref, out_ref, tm=tm,
                    ignore_index=ignore_index, row_limit=None)

    if ragged_rows is not None:
        # The single, final, partially-filled block. Its valid row count is a
        # static Python int, so the mask is one iota + one compare, and only
        # the first chunk(s) covering valid rows are even touched.
        @pl.when(block_id == nb_full)
        def _():
            _accumulate(inp_ref, tgt_ref, out_ref, tm=tm,
                        ignore_index=ignore_index, row_limit=ragged_rows)


def masking_mse_loss(inp, tgt, ignore_index):
    """JAX wrapper: stream the lane-aligned prefix through the Pallas kernel,
    fold the tiny unaligned remainder in with pure jnp."""
    assert inp.shape == tgt.shape
    n = inp.size
    if n == 0:
        return jnp.float32(float("nan"))  # mean over zero elements

    flat_i = inp.reshape(-1)   # no copy; keep native dtype
    flat_t = tgt.reshape(-1)

    min_sub = max(_min_sublanes(inp.dtype), _min_sublanes(tgt.dtype))
    rows_full = n // LANE
    rows_main = (rows_full // min_sub) * min_sub   # rows handled by the kernel

    total = jnp.float32(0.0)

    if rows_main > 0:
        a = flat_i[: rows_main * LANE].reshape(rows_main, LANE)
        b = flat_t[: rows_main * LANE].reshape(rows_main, LANE)

        # Block rows: whole prefix if it fits, else the 4 MiB (f32) cap.
        tm_cap = (TARGET_BLOCK_BYTES // (LANE * 4) // min_sub) * min_sub
        tm = rows_main if rows_main <= tm_cap else tm_cap
        nb = -(-rows_main // tm)                  # number of row-blocks
        ragged = rows_main % tm                   # valid rows of the last block (0 = full)
        nb_full = nb - 1 if ragged else nb
        ragged_rows = ragged if ragged else None

        ncores = min(NCORES, nb)
        steps = -(-nb // ncores)                  # blocks per core

        def in_map(c, s):
            # Clamp so the auto-DMA never addresses a block past the array;
            # clamped duplicates are skipped in-kernel (pl.when on block_id).
            return (jnp.minimum(c * steps + s, nb - 1), 0)

        kernel = functools.partial(
            _masked_mse_kernel,
            ignore_index=ignore_index, tm=tm, steps_per_core=steps,
            nb_full=nb_full, ragged_rows=ragged_rows)

        partials = pl.pallas_call(
            kernel,
            out_shape=jax.ShapeDtypeStruct((ncores * SUB, LANE), jnp.float32),
            grid_spec=pltpu.PrefetchScalarGridSpec(
                num_scalar_prefetch=0,
                grid=(ncores, steps),
                in_specs=[
                    pl.BlockSpec((tm, LANE), in_map),
                    pl.BlockSpec((tm, LANE), in_map),
                ],
                out_specs=pl.BlockSpec((SUB, LANE), lambda c, s: (c, 0)),
            ),
            compiler_params=pltpu.CompilerParams(
                dimension_semantics=("parallel", "arbitrary"),
                # 2 inputs x 2 pipeline buffers x 4 MiB = 16 MiB window buffers
                # plus chunk-sized temporaries; 40 MiB covers it on all chips
                # (v5e default scoped limit is only 16 MiB; v7x physical is 64).
                vmem_limit_bytes=40 * 1024 * 1024),
        )(a, b)
        total = total + jnp.sum(partials)

    # Tail: < min_sub rows plus the <128-element lane remainder (< ~4.2K
    # elements). Pure-jnp reduction, negligible vs. the streamed prefix, and
    # avoids padding/copying the full arrays.
    tail_start = rows_main * LANE
    if tail_start < n:
        ti = flat_i[tail_start:]
        tt = flat_t[tail_start:]
        keep = tt != jnp.asarray(ignore_index, dtype=tt.dtype)
        dt = jnp.where(keep, ti.astype(jnp.float32) - tt.astype(jnp.float32),
                       jnp.float32(0.0))
        total = total + jnp.sum(dt * dt)

    # Mean over the ORIGINAL numel (PyTorch MSELoss(reduction='mean')).
    return total / jnp.float32(n)


def _reference(inp, tgt, ignore_index):
    mask = tgt != ignore_index
    x = jnp.where(mask, inp.astype(jnp.float32), 0.0)
    t = jnp.where(mask, tgt.astype(jnp.float32), 0.0)
    return jnp.mean((x - t) ** 2)


# TODO(synk): only MSELoss(reduction='mean') is implemented as the wrapped loss;
# SmoothL1Loss / L1Loss would need their own elementwise variants of this kernel.

if __name__ == "__main__":
    key = jax.random.PRNGKey(0)
    ignore_index = -1.0

    def make_case(shape, p, keys):
        k1, k2, k3 = keys
        x = jax.random.normal(k1, shape, dtype=jnp.float32)
        t = jax.random.normal(k2, shape, dtype=jnp.float32)
        drop = jax.random.bernoulli(k3, p=p, shape=shape)
        t = jnp.where(drop, jnp.float32(ignore_index), t)
        return x, t

    # 1) Standard small case: single full block through the kernel.
    keys = jax.random.split(key, 3)
    x, t = make_case((2, 4, 16, 16), 0.3, keys)
    loss = jax.block_until_ready(masking_mse_loss(x, t, ignore_index))
    ref = _reference(x, t, ignore_index)
    assert jnp.allclose(loss, ref, rtol=1e-5, atol=1e-6), (loss, ref)

    # 2) Tiny ragged case: exercised entirely by the pure-jnp tail path.
    keys = jax.random.split(keys[0], 3)
    x2, t2 = make_case((2, 3, 7, 5), 0.25, keys)
    loss2 = jax.block_until_ready(masking_mse_loss(x2, t2, ignore_index))
    ref2 = _reference(x2, t2, ignore_index)
    assert jnp.allclose(loss2, ref2, rtol=1e-5, atol=1e-6), (loss2, ref2)

    # 3) Larger unaligned case: exercises multi-block streaming, the ragged
    #    last block branch, the skipped clamped duplicate block, the 2-way
    #    "parallel" core axis, and the jnp tail — all together.
    keys = jax.random.split(keys[0], 3)
    x3, t3 = make_case((2, 8, 1023, 129), 0.2, keys)
    loss3 = jax.block_until_ready(masking_mse_loss(x3, t3, ignore_index))
    ref3 = _reference(x3, t3, ignore_index)
    assert jnp.allclose(loss3, ref3, rtol=1e-4, atol=1e-6), (loss3, ref3)

    print("KERNEL_OK")
</pallas_src>

<mosaic_0001>
module attributes {stable_mosaic.version = 11 : i64} {
  func.func @_masked_mse_kernel(%arg0: i32, %arg1: i32, %arg2: memref<16x128xf32, #tpu.memory_space<vmem>>, %arg3: memref<16x128xf32, #tpu.memory_space<vmem>>, %arg4: memref<8x128xf32, #tpu.memory_space<vmem>>) attributes {dimension_semantics = [#tpu.dimension_semantics<parallel>, #tpu.dimension_semantics<arbitrary>], iteration_bounds = array<i64: 1, 1>, scalar_prefetch = 0 : i64, scratch_operands = 0 : i64, tpu.core_type = #tpu.core_type<tc>, window_params = [{transform_indices = @transform_0, window_bounds = array<i64: 16, 128>}, {transform_indices = @transform_1, window_bounds = array<i64: 16, 128>}, {transform_indices = @transform_2, window_bounds = array<i64: 8, 128>}]} {
    %c1_i32 = arith.constant 1 : i32
    %0 = arith.muli %arg0, %c1_i32 : i32
    %1 = arith.addi %0, %arg1 : i32
    %c0_i32 = arith.constant 0 : i32
    %2 = arith.cmpi eq, %arg1, %c0_i32 : i32
    %3 = arith.extui %2 : i1 to i32
    %c0_i32_0 = arith.constant 0 : i32
    %4 = arith.cmpi ne, %3, %c0_i32_0 : i32
    scf.if %4 {
      %cst = arith.constant 0.000000e+00 : f32
      %8 = vector.broadcast %cst : f32 to vector<8x128xf32>
      %c0 = arith.constant 0 : index
      %c0_3 = arith.constant 0 : index
      %9 = vector.load %arg4[%c0, %c0_3] : memref<8x128xf32, #tpu.memory_space<vmem>>, vector<8x128xf32>
      tpu.vector_store %arg4[%c0, %c0_3], %8 {strides = array<i32>} : memref<8x128xf32, #tpu.memory_space<vmem>>, vector<8x128xf32>,
    } else {
    }
    %c1_i32_1 = arith.constant 1 : i32
    %5 = arith.cmpi slt, %1, %c1_i32_1 : i32
    %6 = arith.extui %5 : i1 to i32
    %c0_i32_2 = arith.constant 0 : i32
    %7 = arith.cmpi ne, %6, %c0_i32_2 : i32
    scf.if %7 {
      %c0 = arith.constant 0 : index
      %c0_3 = arith.constant 0 : index
      %8 = vector.load %arg2[%c0, %c0_3] : memref<16x128xf32, #tpu.memory_space<vmem>>, vector<8x128xf32>
      %c0_4 = arith.constant 0 : index
      %c0_5 = arith.constant 0 : index
      %9 = vector.load %arg3[%c0_4, %c0_5] : memref<16x128xf32, #tpu.memory_space<vmem>>, vector<8x128xf32>
      %cst = arith.constant -1.000000e+00 : f32
      %10 = vector.broadcast %cst : f32 to vector<8x128xf32>
      %11 = arith.cmpf one, %9, %10 : vector<8x128xf32>
      %12 = arith.subf %8, %9 : vector<8x128xf32>
      %cst_6 = arith.constant 0.000000e+00 : f32
      %13 = vector.broadcast %cst_6 : f32 to vector<8x128xf32>
      %14 = arith.select %11, %12, %13 : vector<8x128xi1>, vector<8x128xf32>
      %15 = arith.mulf %14, %14 : vector<8x128xf32>
      %16 = vector.shape_cast %15 : vector<8x128xf32> to vector<1x8x128xf32>
      %cst_7 = arith.constant dense<0.000000e+00> : vector<8x128xf32>
      %17 = vector.multi_reduction <add>, %16, %cst_7 [0] : vector<1x8x128xf32> to vector<8x128xf32>
      %c8 = arith.constant 8 : index
      %c0_8 = arith.constant 0 : index
      %18 = vector.load %arg2[%c8, %c0_8] : memref<16x128xf32, #tpu.memory_space<vmem>>, vector<8x128xf32>
      %c8_9 = arith.constant 8 : index
      %c0_10 = arith.constant 0 : index
      %19 = vector.load %arg3[%c8_9, %c0_10] : memref<16x128xf32, #tpu.memory_space<vmem>>, vector<8x128xf32>
      %cst_11 = arith.constant -1.000000e+00 : f32
      %20 = vector.broadcast %cst_11 : f32 to vector<8x128xf32>
      %21 = arith.cmpf one, %19, %20 : vector<8x128xf32>
      %22 = arith.subf %18, %19 : vector<8x128xf32>
      %cst_12 = arith.constant 0.000000e+00 : f32
      %23 = vector.broadcast %cst_12 : f32 to vector<8x128xf32>
      %24 = arith.select %21, %22, %23 : vector<8x128xi1>, vector<8x128xf32>
      %25 = arith.mulf %24, %24 : vector<8x128xf32>
      %26 = vector.shape_cast %25 : vector<8x128xf32> to vector<1x8x128xf32>
      %cst_13 = arith.constant dense<0.000000e+00> : vector<8x128xf32>
      %27 = vector.multi_reduction <add>, %26, %cst_13 [0] : vector<1x8x128xf32> to vector<8x128xf32>
      %28 = arith.addf %17, %27 : vector<8x128xf32>
      %c0_14 = arith.constant 0 : index
      %c0_15 = arith.constant 0 : index
      %29 = vector.load %arg4[%c0_14, %c0_15] : memref<8x128xf32, #tpu.memory_space<vmem>>, vector<8x128xf32>
      %30 = arith.addf %29, %28 : vector<8x128xf32>
      %c0_16 = arith.constant 0 : index
      %c0_17 = arith.constant 0 : index
      %31 = vector.load %arg4[%c0_16, %c0_17] : memref<8x128xf32, #tpu.memory_space<vmem>>, vector<8x128xf32>
      tpu.vector_store %arg4[%c0_16, %c0_17], %30 {strides = array<i32>} : memref<8x128xf32, #tpu.memory_space<vmem>>, vector<8x128xf32>,
    } else {
    }
    return
  }
  func.func @transform_0(%arg0: i32, %arg1: i32) -> (i32, i32) {
    %c1_i32 = arith.constant 1 : i32
    %0 = arith.muli %arg0, %c1_i32 : i32
    %1 = arith.addi %0, %arg1 : i32
    %c0_i32 = arith.constant 0 : i32
    %2 = arith.minsi %1, %c0_i32 : i32
    %c0_i32_0 = arith.constant 0 : i32
    %c0_i32_1 = arith.constant 0 : i32
    return %2, %c0_i32_0 : i32, i32
  }
  func.func @transform_1(%arg0: i32, %arg1: i32) -> (i32, i32) {
    %c1_i32 = arith.constant 1 : i32
    %0 = arith.muli %arg0, %c1_i32 : i32
    %1 = arith.addi %0, %arg1 : i32
    %c0_i32 = arith.constant 0 : i32
    %2 = arith.minsi %1, %c0_i32 : i32
    %c0_i32_0 = arith.constant 0 : i32
    %c0_i32_1 = arith.constant 0 : i32
    return %2, %c0_i32_0 : i32, i32
  }
  func.func @transform_2(%arg0: i32, %arg1: i32) -> (i32, i32) {
    %c0_i32 = arith.constant 0 : i32
    %c0_i32_0 = arith.constant 0 : i32
    return %arg0, %c0_i32 : i32, i32
  }
}

</mosaic_0001>

<bundles_post_ra>
// kernel: tpu_custom_call.1
= control target key start
LH: loop header
LB: loop body
LE: loop exit
PB: predicated region body
PF: predicated region fallthrough
CT: control target
= control target key end

     0   :  { %7 = vsyncpa [#allocation3], 0  ;;  %s242_s0 = inlined_call_operand.hbm [shape: f32[16,128], index: 0, kind: input, shape index: {}]   ;;  %s243_s1 = inlined_call_operand.hbm [shape: f32[16,128], index: 1, kind: input, shape index: {}]   ;;  %s244_s2 = inlined_call_operand.hbm [shape: f32[8,128], index: 2, kind: output, shape index: {}]  }
   0x1   :  { %8 = vsyncpa [#allocation6], 0 }
   0x2   :  { %9 = vsyncpa [#allocation4], 0  ;;  %s186_s9 = smov [#allocation2]   ;;  %s114_s13 = scalar_lea.hbm %s242_s0, 256 }
   0x3   :  { %s21_s10 = sshll.u32 %s186_s9, 4  ;;  %p115_p0 = scmp.ne.s32.totalorder %s242_s0, %s114_s13  ;;  %s22_s10 = int_to_ptr.vmem [resolvable:$true] %s21_s10 }
   0x4   :  { %p118_p1 = scmp.lt.u32.totalorder %s114_s13, %s242_s0 }
   0x6   :  { %p120_p2 = pnand %p118_p1, %p115_p0 }
   0x8   :  { %123 = shalt.err (!%p120_p2)
}
   0x9   :  { %s124_s18 = scalar_lea.vmem %s22_s10, 256  ;;  %p129_p4 = scmp.lt.s32.totalorder %s22_s10, %s22_s10 }
   0xa   :  { %p125_p3 = scmp.ne.s32.totalorder %s22_s10, %s124_s18  ;;  %p130_p5 = scmp.lt.s32.totalorder %s124_s18, %s124_s18 }
   0xc   :  { %p131_p6 = por %p130_p5, %p129_p4 }
   0xe   :  { %p132_p7 = pnand %p131_p6, %p125_p3 }
  0x10   :  { %135 = shalt.err (!%p132_p7)
}
  0x11   :  { %s187_s19 = smov 128   ;;  %s188_s20 = smov 8  }
  0x12   :  { %27 = dma.hbm_to_vmem [thread:$0]  %s242_s0, 256, %s22_s10, [#allocation3], %s187_s19, %s187_s19, %s188_s20  }
  0x13   :  { %s189_s23 = smov [#allocation5]   ;;  %s136_s27 = scalar_lea.hbm %s243_s1, 256 }
  0x14   :  { %s39_s24 = sshll.u32 %s189_s23, 4  ;;  %p137_p8 = scmp.ne.s32.totalorder %s243_s1, %s136_s27  ;;  %s40_s24 = int_to_ptr.vmem [resolvable:$true] %s39_s24 }
  0x15   :  { %p140_p9 = scmp.lt.u32.totalorder %s136_s27, %s243_s1 }
  0x17   :  { %p142_p10 = pnand %p140_p9, %p137_p8 }
  0x19   :  { %145 = shalt.err (!%p142_p10)
}
  0x1a   :  { %s146_s4 = scalar_lea.vmem %s40_s24, 256  ;;  %p151_p12 = scmp.lt.s32.totalorder %s40_s24, %s40_s24 }
  0x1b   :  { %p147_p11 = scmp.ne.s32.totalorder %s40_s24, %s146_s4  ;;  %p152_p13 = scmp.lt.s32.totalorder %s146_s4, %s146_s4 }
  0x1d   :  { %p153_p0 = por %p152_p13, %p151_p12 }
  0x1f   :  { %p154_p1 = pnand %p153_p0, %p147_p11 }
  0x21   :  { %157 = shalt.err (!%p154_p1)
}
  0x22   :  { %45 = dma.hbm_to_vmem [thread:$0]  %s243_s1, 256, %s40_s24, [#allocation6], %s187_s19, %s187_s19, %s188_s20  }
  0x23   :  { %180 = dma.done.wait [#allocation3], 256  }
  0x24   :  { %181 = vsyncadd [#allocation3], 4294967040 }
  0x25   :  { %182 = dma.done.wait [#allocation6], 256  }
  0x26   :  { %183 = vsyncadd [#allocation6], 4294967040  ;;  %v70_v0 = vld [vmem:[#allocation2] sm:$0xff]  ;;  %v71_v1 = vld [vmem:[#allocation5] sm:$0xff]  ;;  %s190_s6 = smov [#allocation7]  }
  0x27   :  { %v77_v2 = vld [vmem:[#allocation2 + $0x8] sm:$0xff]  ;;  %vm72_vm0 = vcmp.ne.f32.partialorder %v71_v1, -1.0  ;;  %v73_v3 = vsub.f32 %v70_v0, %v71_v1  ;;  %v78_v4 = vld [vmem:[#allocation5 + $0x8] sm:$0xff]  ;;  %s94_s7 = sshll.u32 %s190_s6, 4  ;;  %s95_s7 = int_to_ptr.vmem [resolvable:$true] %s94_s7 }
  0x28   :  { %vm79_vm1 = vcmp.ne.f32.partialorder %v78_v4, -1.0  ;;  %v80_v5 = vsub.f32 %v77_v2, %v78_v4  ;;  %s158_s1 = scalar_lea.vmem %s95_s7, 128  ;;  %p163_p3 = scmp.lt.s32.totalorder %s95_s7, %s95_s7 }
  0x29   :  { %v74_v6 = vsel %vm72_vm0, %v73_v3, 0.0  ;;  %p159_p2 = scmp.ne.s32.totalorder %s95_s7, %s158_s1  ;;  %p164_p4 = scmp.lt.s32.totalorder %s158_s1, %s158_s1 }
  0x2a   :  { %v75_v7 = vmul.f32 %v74_v6, %v74_v6  ;;  %v81_v8 = vsel %vm79_vm1, %v80_v5, 0.0 }
  0x2b   :  { %v82_v9 = vmul.f32 %v81_v8, %v81_v8  ;;  %p165_p5 = por %p164_p4, %p163_p3 }
  0x2d   :  { %v84_v10 = vadd.f32 %v82_v9, %v75_v7  ;;  %p166_p6 = pnand %p165_p5, %p159_p2 }
  0x2f   :  { %87 = vst [vmem:[#allocation7] sm:$0xff] %v84_v10 }
  0x30   :  { %169 = shalt.err (!%p166_p6)
}
  0x31   :  { %s170_s10 = scalar_lea.hbm %s244_s2, 128 }
  0x32   :  { %p171_p7 = scmp.ne.s32.totalorder %s244_s2, %s170_s10  ;;  %p174_p8 = scmp.lt.u32.totalorder %s170_s10, %s244_s2 }
  0x34   :  { %p176_p9 = pnand %p174_p8, %p171_p7 }
  0x36   :  { %179 = shalt.err (!%p176_p9)
}
  0x37   :  { %97 = dma.vmem_to_hbm [thread:$0]  %s95_s7, 128, %s244_s2, [#allocation4]  }
  0x38   :  { %184 = dma.done.wait [#allocation4], 128  }
  0x39   :  { %185 = vsyncadd [#allocation4], 4294967168 }
  0x3a   :  { %101 = vsyncpa [#allocation3], 1 }
  0x3b   :  { %102 = vsyncpa [#allocation6], 1 }
  0x3c   :  { %103 = vsyncpa [#allocation4], 1 }

</bundles_post_ra>
